<compile_context>
chip_gen: v5e
topology: v5e:2x2
jax: 0.10.0
libtpu: 0.0.40
codegen_flags: <defaults>
</compile_context>

<pallas_src>
import functools

import jax
import jax.numpy as jnp
from jax.experimental import pallas as pl
from jax.experimental.pallas import tpu as pltpu

LANE = 128      # lane width (last dim)
SUBLANE = 8     # sublane width (second-to-last dim)


def _round_up(x, m):
    return (x + m - 1) // m * m


def _cdiv(a, b):
    return -(-a // b)


# ---------------------------------------------------------------------------
# Fused Pallas kernel: quant_input -> fc1+relu+quant -> fc2+relu+quant -> fc3
# ---------------------------------------------------------------------------

def _quant_mlp_kernel(scales_ref, x_ref, w1_ref, b1_ref, w2_ref, b2_ref,
                      w3_ref, b3_ref, o_ref, *, n_bits):
    q_s_max = float(2 ** (n_bits - 1) - 1)     # signed qmax (input quant)
    q_s_min = float(-(2 ** (n_bits - 1)))      # signed qmin
    q_u_max = float(2 ** n_bits - 1)           # unsigned qmax (post-ReLU quant)

    # static per-tensor scales (SMEM scalars), precombined per dot:
    inv_s_in = scales_ref[0]   # 1 / s_in
    out_s1 = scales_ref[1]     # s_in  * s_w1
    inv_s_a1 = scales_ref[2]   # 1 / s_act1
    out_s2 = scales_ref[3]     # s_act1 * s_w2
    inv_s_a2 = scales_ref[4]   # 1 / s_act2
    out_s3 = scales_ref[5]     # s_act2 * s_w3

    # quant_input (QuantIdentity, signed symmetric): integer-valued bf16 for the MXU
    xq = jnp.clip(jnp.round(x_ref[...].astype(jnp.float32) * inv_s_in),
                  q_s_min, q_s_max)

    # linear1 + relu1 (QuantReLU, unsigned act quant)
    acc = jnp.dot(xq.astype(jnp.bfloat16), w1_ref[...],
                  preferred_element_type=jnp.float32)
    h = jnp.maximum(acc * out_s1 + b1_ref[...], 0.0)
    hq = jnp.clip(jnp.round(h * inv_s_a1), 0.0, q_u_max)

    # linear2 + relu2 (QuantReLU, unsigned act quant)
    acc = jnp.dot(hq.astype(jnp.bfloat16), w2_ref[...],
                  preferred_element_type=jnp.float32)
    h = jnp.maximum(acc * out_s2 + b2_ref[...], 0.0)
    hq = jnp.clip(jnp.round(h * inv_s_a2), 0.0, q_u_max)

    # linear3 (output = dequantized .value)
    acc = jnp.dot(hq.astype(jnp.bfloat16), w3_ref[...],
                  preferred_element_type=jnp.float32)
    o_ref[...] = (acc * out_s3 + b3_ref[...]).astype(o_ref.dtype)


# ---------------------------------------------------------------------------
# Parameter setup: PyTorch-like init, 5-bit weight quant, static act-scale calibration,
# pad/transpose/cast ONCE.
# ---------------------------------------------------------------------------

def _quant_weight(w, n_bits):
    """Per-tensor symmetric weight quant; returns integer codes and the scale."""
    qmax = float(2 ** (n_bits - 1) - 1)
    qmin = float(-(2 ** (n_bits - 1)))
    s = jnp.maximum(jnp.max(jnp.abs(w)), 1e-12) / qmax
    q = jnp.clip(jnp.round(w / s), qmin, qmax)
    return q, s


def init_params(key, input_shape, output_shape, hidden_shape=100, n_bits=5,
                x_calib=None):
    ks = jax.random.split(key, 6)

    def torch_linear(kw, kb, fin, fout):
        bound = 1.0 / jnp.sqrt(jnp.float32(fin))
        w = jax.random.uniform(kw, (fout, fin), jnp.float32, -bound, bound)
        b = jax.random.uniform(kb, (fout,), jnp.float32, -bound, bound)
        return w, b

    w1, b1 = torch_linear(ks[0], ks[1], input_shape, hidden_shape)
    w2, b2 = torch_linear(ks[2], ks[3], hidden_shape, hidden_shape)
    w3, b3 = torch_linear(ks[4], ks[5], hidden_shape, output_shape)

    # 5-bit per-tensor symmetric weight quant (Int*WeightPerTensorFloat-style)
    q1, sw1 = _quant_weight(w1, n_bits)
    q2, sw2 = _quant_weight(w2, n_bits)
    q3, sw3 = _quant_weight(w3, n_bits)

    # --- static activation-scale calibration (plain-JAX reference forward) ---
    q_s_max = float(2 ** (n_bits - 1) - 1)
    q_s_min = float(-(2 ** (n_bits - 1)))
    q_u_max = float(2 ** n_bits - 1)
    if x_calib is None:
        x_calib = jax.random.normal(jax.random.PRNGKey(42),
                                    (128, input_shape), jnp.float32)
    w1dq, w2dq, w3dq = q1 * sw1, q2 * sw2, q3 * sw3
    s_in = jnp.maximum(jnp.max(jnp.abs(x_calib)), 1e-12) / q_s_max
    xdq = jnp.clip(jnp.round(x_calib / s_in), q_s_min, q_s_max) * s_in
    h1 = jnp.maximum(xdq @ w1dq.T + b1, 0.0)
    s_a1 = jnp.maximum(jnp.max(h1), 1e-12) / q_u_max
    h1dq = jnp.clip(jnp.round(h1 / s_a1), 0.0, q_u_max) * s_a1
    h2 = jnp.maximum(h1dq @ w2dq.T + b2, 0.0)
    s_a2 = jnp.maximum(jnp.max(h2), 1e-12) / q_u_max
    del w3dq  # linear3 output is dequantized directly; no act scale needed after it

    # Combined scalars consumed from SMEM by the kernel.
    scales = jnp.stack([1.0 / s_in, s_in * sw1,
                        1.0 / s_a1, s_a1 * sw2,
                        1.0 / s_a2, s_a2 * sw3]).astype(jnp.float32)

    def prep(q, b):
        # store INTEGER-valued weights as bf16 (|q| <= 16 -> exactly representable),
        # transposed to (in, out), lane-padded to 128; bias padded f32.
        fout, fin = q.shape
        finp, foutp = _round_up(fin, LANE), _round_up(fout, LANE)
        wp = jnp.zeros((finp, foutp), jnp.bfloat16)
        wp = wp.at[:fin, :fout].set(q.T.astype(jnp.bfloat16))
        bp = jnp.zeros((1, foutp), jnp.float32).at[0, :fout].set(b)
        return wp, bp

    p = {}
    p["w1"], p["b1"] = prep(q1, b1)
    p["w2"], p["b2"] = prep(q2, b2)
    p["w3"], p["b3"] = prep(q3, b3)
    p["scales"] = scales
    p["in_features"] = input_shape
    p["out_features"] = output_shape
    p["n_bits"] = n_bits
    return p


# ---------------------------------------------------------------------------
# Forward wrapper (single pallas_call)
# ---------------------------------------------------------------------------

def quant_custom_forward(x, params):
    B, fin = x.shape
    w1, b1 = params["w1"], params["b1"]
    w2, b2 = params["w2"], params["b2"]
    w3, b3 = params["w3"], params["b3"]
    scales = params["scales"]
    kp, hp = w1.shape          # padded in / hidden
    _, op = w3.shape           # padded out
    n_bits = params["n_bits"]

    # Batch tiling: one tile for small/medium batches (min launch latency); for large
    # batches, <=1024-row tiles with >=2 grid steps so both v7x TensorCores get work.
    mp0 = _round_up(max(B, SUBLANE), SUBLANE)
    if mp0 <= 512:
        tm = mp0
    else:
        n_steps = max(2, _cdiv(mp0, 1024))
        tm = _round_up(_cdiv(mp0, n_steps), SUBLANE)
    mp = _round_up(mp0, tm)

    # bf16 input DMA (lossless vs 5-bit fake-quant; halves activation HBM traffic)
    # TODO(synk): pad/slice are wrapper-side XLA ops; a producer keeping activations
    # in the padded (mp, 128) layout across calls would remove them entirely.
    xp = jnp.zeros((mp, kp), jnp.bfloat16).at[:B, :fin].set(x.astype(jnp.bfloat16))

    kernel = functools.partial(_quant_mlp_kernel, n_bits=n_bits)
    out = pl.pallas_call(
        kernel,
        out_shape=jax.ShapeDtypeStruct((mp, op), jnp.float32),
        grid=(mp // tm,),
        in_specs=[
            pl.BlockSpec(memory_space=pltpu.MemorySpace.SMEM),  # 6 static scales
            pl.BlockSpec((tm, kp), lambda i: (i, 0)),   # x tile (pipelined over M)
            pl.BlockSpec((kp, hp), lambda i: (0, 0)),   # w1 (resident)
            pl.BlockSpec((1, hp), lambda i: (0, 0)),    # b1
            pl.BlockSpec((hp, hp), lambda i: (0, 0)),   # w2
            pl.BlockSpec((1, hp), lambda i: (0, 0)),    # b2
            pl.BlockSpec((hp, op), lambda i: (0, 0)),   # w3
            pl.BlockSpec((1, op), lambda i: (0, 0)),    # b3
        ],
        out_specs=pl.BlockSpec((tm, op), lambda i: (i, 0)),
        compiler_params=pltpu.CompilerParams(
            dimension_semantics=("parallel",)),
    )(scales, xp, w1, b1, w2, b2, w3, b3)

    # slice padded lanes / rows back to the true output
    return out[:B, :params["out_features"]]


if __name__ == "__main__":
    key = jax.random.PRNGKey(0)
    k_x, k_c, k_p = jax.random.split(key, 3)

    batch = 2
    input_shape = 16
    hidden_shape = 100
    output_shape = 4
    n_bits = 5

    x = jax.random.normal(k_x, (batch, input_shape), dtype=jnp.float32)
    x_calib = jax.random.normal(k_c, (128, input_shape), dtype=jnp.float32)
    params = init_params(k_p, input_shape, output_shape, hidden_shape, n_bits,
                         x_calib)

    out = quant_custom_forward(x, params)
    out = jax.block_until_ready(out)
    assert out.shape == (batch, output_shape), out.shape
    assert out.dtype == jnp.float32
    print("KERNEL_OK")
</pallas_src>

<mosaic_0001>
module attributes {stable_mosaic.version = 11 : i64} {
  func.func @_quant_mlp_kernel(%arg0: i32, %arg1: memref<6xf32, #tpu.memory_space<smem>>, %arg2: memref<8x128xbf16, #tpu.memory_space<vmem>>, %arg3: memref<128x128xbf16, #tpu.memory_space<vmem>>, %arg4: memref<1x128xf32, #tpu.memory_space<vmem>>, %arg5: memref<128x128xbf16, #tpu.memory_space<vmem>>, %arg6: memref<1x128xf32, #tpu.memory_space<vmem>>, %arg7: memref<128x128xbf16, #tpu.memory_space<vmem>>, %arg8: memref<1x128xf32, #tpu.memory_space<vmem>>, %arg9: memref<8x128xf32, #tpu.memory_space<vmem>>) attributes {dimension_semantics = [#tpu.dimension_semantics<parallel>], iteration_bounds = array<i64: 1>, scalar_prefetch = 0 : i64, scratch_operands = 0 : i64, tpu.core_type = #tpu.core_type<tc>, window_params = [{transform_indices = @transform_0, window_bounds = array<i64: 6>}, {transform_indices = @transform_1, window_bounds = array<i64: 8, 128>}, {pipeline_mode = #tpu.pipeline_mode<synchronous>, transform_indices = @transform_2, window_bounds = array<i64: 128, 128>}, {pipeline_mode = #tpu.pipeline_mode<synchronous>, transform_indices = @transform_3, window_bounds = array<i64: 1, 128>}, {pipeline_mode = #tpu.pipeline_mode<synchronous>, transform_indices = @transform_4, window_bounds = array<i64: 128, 128>}, {pipeline_mode = #tpu.pipeline_mode<synchronous>, transform_indices = @transform_5, window_bounds = array<i64: 1, 128>}, {pipeline_mode = #tpu.pipeline_mode<synchronous>, transform_indices = @transform_6, window_bounds = array<i64: 128, 128>}, {pipeline_mode = #tpu.pipeline_mode<synchronous>, transform_indices = @transform_7, window_bounds = array<i64: 1, 128>}, {transform_indices = @transform_8, window_bounds = array<i64: 8, 128>}]} {
    %c0 = arith.constant 0 : index
    %0 = memref.load %arg1[%c0] : memref<6xf32, #tpu.memory_space<smem>>
    %c1 = arith.constant 1 : index
    %1 = memref.load %arg1[%c1] : memref<6xf32, #tpu.memory_space<smem>>
    %c2 = arith.constant 2 : index
    %2 = memref.load %arg1[%c2] : memref<6xf32, #tpu.memory_space<smem>>
    %c3 = arith.constant 3 : index
    %3 = memref.load %arg1[%c3] : memref<6xf32, #tpu.memory_space<smem>>
    %c4 = arith.constant 4 : index
    %4 = memref.load %arg1[%c4] : memref<6xf32, #tpu.memory_space<smem>>
    %c5 = arith.constant 5 : index
    %5 = memref.load %arg1[%c5] : memref<6xf32, #tpu.memory_space<smem>>
    %c0_0 = arith.constant 0 : index
    %c0_1 = arith.constant 0 : index
    %6 = vector.load %arg2[%c0_0, %c0_1] : memref<8x128xbf16, #tpu.memory_space<vmem>>, vector<8x128xbf16>
    %7 = arith.extf %6 : vector<8x128xbf16> to vector<8x128xf32>
    %8 = vector.broadcast %0 : f32 to vector<8x128xf32>
    %9 = arith.mulf %7, %8 : vector<8x128xf32>
    %10 = math.roundeven %9 : vector<8x128xf32>
    %cst = arith.constant -1.600000e+01 : f32
    %cst_2 = arith.constant 1.500000e+01 : f32
    %11 = vector.broadcast %cst : f32 to vector<8x128xf32>
    %12 = arith.maximumf %11, %10 : vector<8x128xf32>
    %13 = vector.broadcast %cst_2 : f32 to vector<8x128xf32>
    %14 = arith.minimumf %13, %12 : vector<8x128xf32>
    %15 = arith.truncf %14 : vector<8x128xf32> to vector<8x128xbf16>
    %c0_3 = arith.constant 0 : index
    %c0_4 = arith.constant 0 : index
    %16 = vector.load %arg3[%c0_3, %c0_4] : memref<128x128xbf16, #tpu.memory_space<vmem>>, vector<128x128xbf16>
    %cst_5 = arith.constant dense<0.000000e+00> : vector<8x128xf32>
    %17 = tpu.matmul %15, %16, %cst_5 {dimension_numbers = #tpu.dot_dimension_numbers<[1], [0], [0], [1], [0, 0, 1, 1], [], []>} : vector<8x128xbf16>, vector<128x128xbf16>, vector<8x128xf32> -> vector<8x128xf32>
    %18 = vector.broadcast %1 : f32 to vector<8x128xf32>
    %19 = arith.mulf %17, %18 : vector<8x128xf32>
    %c0_6 = arith.constant 0 : index
    %c0_7 = arith.constant 0 : index
    %20 = vector.load %arg4[%c0_6, %c0_7] : memref<1x128xf32, #tpu.memory_space<vmem>>, vector<1x128xf32>
    %21 = vector.broadcast %20 : vector<1x128xf32> to vector<8x128xf32>
    %22 = arith.addf %19, %21 : vector<8x128xf32>
    %cst_8 = arith.constant 0.000000e+00 : f32
    %23 = vector.broadcast %cst_8 : f32 to vector<8x128xf32>
    %24 = arith.maximumf %22, %23 : vector<8x128xf32>
    %25 = vector.broadcast %2 : f32 to vector<8x128xf32>
    %26 = arith.mulf %24, %25 : vector<8x128xf32>
    %27 = math.roundeven %26 : vector<8x128xf32>
    %cst_9 = arith.constant 0.000000e+00 : f32
    %cst_10 = arith.constant 3.100000e+01 : f32
    %28 = vector.broadcast %cst_9 : f32 to vector<8x128xf32>
    %29 = arith.maximumf %28, %27 : vector<8x128xf32>
    %30 = vector.broadcast %cst_10 : f32 to vector<8x128xf32>
    %31 = arith.minimumf %30, %29 : vector<8x128xf32>
    %32 = arith.truncf %31 : vector<8x128xf32> to vector<8x128xbf16>
    %c0_11 = arith.constant 0 : index
    %c0_12 = arith.constant 0 : index
    %33 = vector.load %arg5[%c0_11, %c0_12] : memref<128x128xbf16, #tpu.memory_space<vmem>>, vector<128x128xbf16>
    %cst_13 = arith.constant dense<0.000000e+00> : vector<8x128xf32>
    %34 = tpu.matmul %32, %33, %cst_13 {dimension_numbers = #tpu.dot_dimension_numbers<[1], [0], [0], [1], [0, 0, 1, 1], [], []>} : vector<8x128xbf16>, vector<128x128xbf16>, vector<8x128xf32> -> vector<8x128xf32>
    %35 = vector.broadcast %3 : f32 to vector<8x128xf32>
    %36 = arith.mulf %34, %35 : vector<8x128xf32>
    %c0_14 = arith.constant 0 : index
    %c0_15 = arith.constant 0 : index
    %37 = vector.load %arg6[%c0_14, %c0_15] : memref<1x128xf32, #tpu.memory_space<vmem>>, vector<1x128xf32>
    %38 = vector.broadcast %37 : vector<1x128xf32> to vector<8x128xf32>
    %39 = arith.addf %36, %38 : vector<8x128xf32>
    %cst_16 = arith.constant 0.000000e+00 : f32
    %40 = vector.broadcast %cst_16 : f32 to vector<8x128xf32>
    %41 = arith.maximumf %39, %40 : vector<8x128xf32>
    %42 = vector.broadcast %4 : f32 to vector<8x128xf32>
    %43 = arith.mulf %41, %42 : vector<8x128xf32>
    %44 = math.roundeven %43 : vector<8x128xf32>
    %cst_17 = arith.constant 0.000000e+00 : f32
    %cst_18 = arith.constant 3.100000e+01 : f32
    %45 = vector.broadcast %cst_17 : f32 to vector<8x128xf32>
    %46 = arith.maximumf %45, %44 : vector<8x128xf32>
    %47 = vector.broadcast %cst_18 : f32 to vector<8x128xf32>
    %48 = arith.minimumf %47, %46 : vector<8x128xf32>
    %49 = arith.truncf %48 : vector<8x128xf32> to vector<8x128xbf16>
    %c0_19 = arith.constant 0 : index
    %c0_20 = arith.constant 0 : index
    %50 = vector.load %arg7[%c0_19, %c0_20] : memref<128x128xbf16, #tpu.memory_space<vmem>>, vector<128x128xbf16>
    %cst_21 = arith.constant dense<0.000000e+00> : vector<8x128xf32>
    %51 = tpu.matmul %49, %50, %cst_21 {dimension_numbers = #tpu.dot_dimension_numbers<[1], [0], [0], [1], [0, 0, 1, 1], [], []>} : vector<8x128xbf16>, vector<128x128xbf16>, vector<8x128xf32> -> vector<8x128xf32>
    %52 = vector.broadcast %5 : f32 to vector<8x128xf32>
    %53 = arith.mulf %51, %52 : vector<8x128xf32>
    %c0_22 = arith.constant 0 : index
    %c0_23 = arith.constant 0 : index
    %54 = vector.load %arg8[%c0_22, %c0_23] : memref<1x128xf32, #tpu.memory_space<vmem>>, vector<1x128xf32>
    %55 = vector.broadcast %54 : vector<1x128xf32> to vector<8x128xf32>
    %56 = arith.addf %53, %55 : vector<8x128xf32>
    %c0_24 = arith.constant 0 : index
    %c0_25 = arith.constant 0 : index
    %57 = vector.load %arg9[%c0_24, %c0_25] : memref<8x128xf32, #tpu.memory_space<vmem>>, vector<8x128xf32>
    tpu.vector_store %arg9[%c0_24, %c0_25], %56 {strides = array<i32>} : memref<8x128xf32, #tpu.memory_space<vmem>>, vector<8x128xf32>,
    return
  }
  func.func @transform_0(%arg0: i32) -> i32 {
    %c0_i32 = arith.constant 0 : i32
    %c0_i32_0 = arith.constant 0 : i32
    return %c0_i32 : i32
  }
  func.func @transform_1(%arg0: i32) -> (i32, i32) {
    %c0_i32 = arith.constant 0 : i32
    %c0_i32_0 = arith.constant 0 : i32
    return %arg0, %c0_i32 : i32, i32
  }
  func.func @transform_2(%arg0: i32) -> (i32, i32) {
    %c0_i32 = arith.constant 0 : i32
    %c0_i32_0 = arith.constant 0 : i32
    %c0_i32_1 = arith.constant 0 : i32
    return %c0_i32, %c0_i32_0 : i32, i32
  }
  func.func @transform_3(%arg0: i32) -> (i32, i32) {
    %c0_i32 = arith.constant 0 : i32
    %c0_i32_0 = arith.constant 0 : i32
    %c0_i32_1 = arith.constant 0 : i32
    return %c0_i32, %c0_i32_0 : i32, i32
  }
  func.func @transform_4(%arg0: i32) -> (i32, i32) {
    %c0_i32 = arith.constant 0 : i32
    %c0_i32_0 = arith.constant 0 : i32
    %c0_i32_1 = arith.constant 0 : i32
    return %c0_i32, %c0_i32_0 : i32, i32
  }
  func.func @transform_5(%arg0: i32) -> (i32, i32) {
    %c0_i32 = arith.constant 0 : i32
    %c0_i32_0 = arith.constant 0 : i32
    %c0_i32_1 = arith.constant 0 : i32
    return %c0_i32, %c0_i32_0 : i32, i32
  }
  func.func @transform_6(%arg0: i32) -> (i32, i32) {
    %c0_i32 = arith.constant 0 : i32
    %c0_i32_0 = arith.constant 0 : i32
    %c0_i32_1 = arith.constant 0 : i32
    return %c0_i32, %c0_i32_0 : i32, i32
  }
  func.func @transform_7(%arg0: i32) -> (i32, i32) {
    %c0_i32 = arith.constant 0 : i32
    %c0_i32_0 = arith.constant 0 : i32
    %c0_i32_1 = arith.constant 0 : i32
    return %c0_i32, %c0_i32_0 : i32, i32
  }
  func.func @transform_8(%arg0: i32) -> (i32, i32) {
    %c0_i32 = arith.constant 0 : i32
    %c0_i32_0 = arith.constant 0 : i32
    return %arg0, %c0_i32 : i32, i32
  }
}

</mosaic_0001>

<bundles_post_ra>
// kernel: tpu_custom_call.1
= control target key start
LH: loop header
LB: loop body
LE: loop exit
PB: predicated region body
PF: predicated region fallthrough
CT: control target
= control target key end

     0   :  { %13 = vsyncpa [#allocation5], 0  ;;  %s787_s0 = inlined_call_operand.hbm [shape: f32[6], index: 0, kind: input, shape index: {}]   ;;  %s788_s1 = inlined_call_operand.hbm [shape: bf16[8,128], index: 1, kind: input, shape index: {}]   ;;  %s789_s2 = inlined_call_operand.hbm [shape: bf16[128,128], index: 2, kind: input, shape index: {}]   ;;  %s790_s3 = inlined_call_operand.vmem [shape: f32[1,128], index: 3, kind: input, shape index: {}]   ;;  %s791_s4 = inlined_call_operand.hbm [shape: bf16[128,128], index: 4, kind: input, shape index: {}]   ;;  %s792_s5 = inlined_call_operand.vmem [shape: f32[1,128], index: 5, kind: input, shape index: {}]   ;;  %s793_s6 = inlined_call_operand.hbm [shape: bf16[128,128], index: 6, kind: input, shape index: {}]   ;;  %s794_s7 = inlined_call_operand.vmem [shape: f32[1,128], index: 7, kind: input, shape index: {}]   ;;  %s795_s8 = inlined_call_operand.hbm [shape: f32[8,128], index: 8, kind: output, shape index: {}]  }
   0x1   :  { %14 = vsyncpa [#allocation3], 0 }
   0x2   :  { %15 = vsyncpa [#allocation8], 0 }
   0x3   :  { %16 = vsyncpa [#allocation11], 0  ;;  %s42_s29 = sshll.u32 %s789_s2, 4  ;;  %s43_s29 = int_to_ptr.hbm [resolvable:$true] %s42_s29 }
   0x4   :  { %17 = vsyncpa [#allocation4], 0  ;;  %s707_s30 = smov [#allocation7]   ;;  %s23_s12 = sshll.u32 %s787_s0, 4  ;;  %s24_s12 = int_to_ptr.hbm [resolvable:$true] %s23_s12 }
   0x5   :  { %s44_s9 = sshll.u32 %s707_s30, 4  ;;  %s708_s13 = smov 64   ;;  %s45_s9 = int_to_ptr.vmem [resolvable:$true] %s44_s9 }
   0x6   :  { %s709_s14 = smov 4   ;;  %s710_s15 = smov [#allocation2]  }
   0x7   :  { %50 = dma.hbm_to_vmem [thread:$0]  %s43_s29, 1024, %s45_s9, [#allocation8], %s708_s13, %s708_s13, %s709_s14  }
   0x8   :  { %26 = dma.hbm_to_smem %s24_s12, 16, %s710_s15, [#allocation5]  }
   0x9   :  { %s32_s18 = sshll.u32 %s788_s1, 4  ;;  %s711_s2 = smov [#allocation6]   ;;  %s33_s18 = int_to_ptr.hbm [resolvable:$true] %s32_s18 }
   0xa   :  { %s34_s19 = sshll.u32 %s711_s2, 4  ;;  %s57_s22 = sshll.u32 %s791_s4, 4  ;;  %s35_s19 = int_to_ptr.vmem [resolvable:$true] %s34_s19  ;;  %s58_s22 = int_to_ptr.hbm [resolvable:$true] %s57_s22 }
   0xb   :  { %37 = dma.hbm_to_vmem [thread:$0]  %s33_s18, 64, %s35_s19, [#allocation3]  }
   0xc   :  { %s712_s0 = smov [#allocation9]   ;;  %s72_s26 = sshll.u32 %s793_s6, 4  ;;  %s73_s26 = int_to_ptr.hbm [resolvable:$true] %s72_s26 }
   0xd   :  { %s59_s23 = sshll.u32 %s712_s0, 4  ;;  %s713_s1 = smov [#allocation10]   ;;  %s60_s23 = int_to_ptr.vmem [resolvable:$true] %s59_s23 }
   0xe   :  { %65 = dma.hbm_to_vmem [thread:$0]  %s58_s22, 1024, %s60_s23, [#allocation8], %s708_s13, %s708_s13, %s709_s14  }
   0xf   :  { %s74_s27 = sshll.u32 %s713_s1, 4  ;;  %s75_s27 = int_to_ptr.vmem [resolvable:$true] %s74_s27 }
  0x10   :  { %80 = dma.hbm_to_vmem [thread:$0]  %s73_s26, 1024, %s75_s27, [#allocation11], %s708_s13, %s708_s13, %s709_s14  }
  0x11   :  { %697 = dma.done.wait [#allocation5], 16  }
  0x12   :  { %698 = vsyncadd [#allocation5], 4294967280 }
  0x13   :  { %699 = dma.done.wait [#allocation3], 64  }
  0x14   :  { %700 = vsyncadd [#allocation3], 4294967232 }
  0x15   :  { %701 = dma.done.wait [#allocation8], 2048  }
  0x16   :  { %702 = vsyncadd [#allocation8], 4294965248 }
  0x17   :  { %703 = dma.done.wait [#allocation11], 1024  }
  0x18   :  { %704 = vsyncadd [#allocation11], 4294966272 }
  0x19   :  { %103 = sfence }
  0x1a   :  { %v513_v0 = vld [vmem:[#allocation7 + $0x38] sm:$0xff]  ;;  %s104_s4 = sld [smem:[#allocation2]]  ;;  %v512_v1 = vld [vmem:[#allocation7 + $0x30] sm:$0xff]  ;;  %v511_v6 = vld [vmem:[#allocation7 + $0x28] sm:$0xff]  ;;  %s714_s14 = smov [#allocation12]  }
  0x1b   :  { %182 = vmatpush.bf16.msra.mxu0 %v513_v0  ;;  %v110_v2 = vld [vmem:[#allocation6] sm:$0xf]  ;;  %v520_v5 = vld [vmem:[#allocation9 + $0x30] sm:$0xff]  ;;  %v510_v10 = vld [vmem:[#allocation7 + $0x20] sm:$0xff]  ;;  %s405_s6 = sld [smem:[#allocation2 + $0x1]]  ;;  %s390_s15 = sshll.u32 %s714_s14, 4  ;;  %s391_s15 = int_to_ptr.vmem [resolvable:$true] %s390_s15 }
  0x1c   :  { %v111_v3 = vunpack.c.l.bf16 %v110_v2  ;;  %v521_v4 = vld [vmem:[#allocation9 + $0x38] sm:$0xff]  ;;  %v508_v17 = vld [vmem:[#allocation7 + $0x10] sm:$0xff]  ;;  %v507_v20 = vld [vmem:[#allocation7 + $0x8] sm:$0xff]  ;;  %s406_s28 = sld [smem:[#allocation2 + $0x2]]  ;;  %s392_s18 = sshll.u32 %s795_s8, 4  ;;  %s393_s18 = int_to_ptr.hbm [resolvable:$true] %s392_s18 }
  0x1d   :  { %273 = vmatpush.bf16.msra.mxu1 %v521_v4  ;;  %v509_v15 = vld [vmem:[#allocation7 + $0x18] sm:$0xff]  ;;  %v506_v22 = vld [vmem:[#allocation7] sm:$0xff]  ;;  %v519_v24 = vld [vmem:[#allocation9 + $0x28] sm:$0xff]  ;;  %s408_s9 = sld [smem:[#allocation2 + $0x4]] }
  0x1e   :  { %v518_v25 = vld [vmem:[#allocation9 + $0x20] sm:$0xff]  ;;  %v517_v26 = vld [vmem:[#allocation9 + $0x18] sm:$0xff]  ;;  %v516_v27 = vld [vmem:[#allocation9 + $0x10] sm:$0xff] }
  0x1f   :  { %183 = vmatpush.bf16.msra.mxu0 %v512_v1  ;;  %v515_v28 = vld [vmem:[#allocation9 + $0x8] sm:$0xff]  ;;  %v514_v29 = vld [vmem:[#allocation9] sm:$0xff]  ;;  %v529_v30 = vld [vmem:[#allocation10 + $0x38] sm:$0xff] }
  0x20   :  { %v112_v7 = vstv %s104_s4  ;;  %364 = vmatpush.bf16.msra.mxu2 %v529_v30  ;;  %v528_v31 = vld [vmem:[#allocation10 + $0x30] sm:$0xff]  ;;  %v562_v33 = vld [vmem:[%s790_s3] ss:$0 sm:$0xff]  ;;  %v527_v51 = vld [vmem:[#allocation10 + $0x28] sm:$0xff]  ;;  %s407_s3 = sld [smem:[#allocation2 + $0x3]] }
  0x21   :  { %v113_v8 = vmul.f32 %v112_v7, %v111_v3  ;;  %274 = vmatpush.bf16.msra.mxu1 %v520_v5  ;;  %v195_v32 = vstv %s405_s6  ;;  %v526_v52 = vld [vmem:[#allocation10 + $0x20] sm:$0xff]  ;;  %v525_v53 = vld [vmem:[#allocation10 + $0x18] sm:$0xff]  ;;  %v524_v54 = vld [vmem:[#allocation10 + $0x10] sm:$0xff] }
  0x22   :  { %v203_v37 = vstv %s406_s28  ;;  %v523_v55 = vld [vmem:[#allocation10 + $0x8] sm:$0xff]  ;;  %v522_v56 = vld [vmem:[#allocation10] sm:$0xff]  ;;  %v563_v58 = vld [vmem:[%s792_s5] ss:$0 sm:$0xff]  ;;  %s409_s5 = sld [smem:[#allocation2 + $0x5]] }
  0x23   :  { %v532_v9 = vcvt.f32.s32 %v113_v8  ;;  %184 = vmatpush.bf16.msra.mxu0 %v511_v6  ;;  %v530_v11 = vand.u32 2147483647, %v113_v8  ;;  %v535_v13 = vand.u32 2147483648, %v113_v8  ;;  %v294_v62 = vstv %s408_s9 }
  0x24   :  { %365 = vmatpush.bf16.msra.mxu2 %v528_v31 }
  0x25   :  { %v533_v12 = vcvt.s32.f32 %v532_v9  ;;  %vm531_vm0 = vcmp.lt.f32.partialorder %v530_v11, 8388608.0  ;;  %275 = vmatpush.bf16.msra.mxu1 %v519_v24 }
  0x26   :  { %v286_v57 = vstv %s407_s3 }
  0x27   :  { %v534_v14 = vand.u32 2147483647, %v533_v12  ;;  %185 = vmatpush.bf16.msra.mxu0 %v510_v10 }
  0x28   :  { %366 = vmatpush.bf16.msra.mxu2 %v527_v51  ;;  %v377_v12 = vstv %s409_s5 }
  0x29   :  { %v536_v16 = vor.u32 %v535_v13, %v534_v14  ;;  %276 = vmatpush.bf16.msra.mxu1 %v518_v25  ;;  %v564_v13 = vld [vmem:[%s794_s7] ss:$0 sm:$0xff] }
  0x2b   :  { %186 = vmatpush.bf16.msra.mxu0 %v509_v15  ;;  %v537_v18 = vsel %vm531_vm0, %v536_v16, %v113_v8 }
  0x2c   :  { %v115_v19 = vmax.f32 %v537_v18, -16.0  ;;  %367 = vmatpush.bf16.msra.mxu2 %v526_v52 }
  0x2d   :  { %277 = vmatpush.bf16.msra.mxu1 %v517_v26 }
  0x2e   :  { %v116_v21 = vmin.f32 %v115_v19, 15.0 }
  0x2f   :  { %187 = vmatpush.bf16.msra.mxu0 %v508_v17 }
  0x30   :  { %v117_v23 = vpack.c.bf16 %v116_v21, %v116_v21  ;;  %368 = vmatpush.bf16.msra.mxu2 %v525_v53 }
  0x31   :  { %278 = vmatpush.bf16.msra.mxu1 %v516_v27 }
  0x33   :  { %188 = vmatpush.bf16.msra.mxu0 %v507_v20 }
  0x34   :  { %369 = vmatpush.bf16.msra.mxu2 %v524_v54 }
  0x35   :  { %279 = vmatpush.bf16.msra.mxu1 %v515_v28 }
  0x37   :  { %189 = vmatpush.bf16.msra.mxu0 %v506_v22 }
  0x38   :  { %370 = vmatpush.bf16.msra.mxu2 %v523_v55 }
  0x39   :  { %280 = vmatpush.bf16.msra.mxu1 %v514_v29 }
  0x3a   :  { %190 = vmatmul.bf16.vlgmr.msra.gmra.mxu0 %v117_v23 }
  0x3c   :  { %371 = vmatpush.bf16.msra.mxu2 %v522_v56 }
  0xb7   :  { %v191_v34 = vpop.f32.mrf.mxu0 }
  0xb8   :  { %v196_v35 = vmul.f32 %v195_v32, %v191_v34 }
  0xba   :  { %v201_v36 = vadd.f32 %v562_v33, %v196_v35 }
  0xbc   :  { %v202_v38 = vmax.f32 %v201_v36, 0.0 }
  0xbe   :  { %v204_v39 = vmul.f32 %v203_v37, %v202_v38 }
  0xbf   :  { %v193_v40 = vpop.f32.mrf.mxu0 }
  0xc0   :  { %v540_v41 = vcvt.f32.s32 %v204_v39  ;;  %v538_v43 = vand.u32 2147483647, %v204_v39  ;;  %v543_v45 = vand.u32 2147483648, %v204_v39 }
  0xc2   :  { %v541_v42 = vcvt.s32.f32 %v540_v41  ;;  %vm539_vm1 = vcmp.lt.f32.partialorder %v538_v43, 8388608.0 }
  0xc4   :  { %v542_v44 = vand.u32 2147483647, %v541_v42 }
  0xc6   :  { %v544_v46 = vor.u32 %v543_v45, %v542_v44 }
  0xc8   :  { %v545_v47 = vsel %vm539_vm1, %v544_v46, %v204_v39 }
  0xc9   :  { %v206_v48 = vmax.f32 %v545_v47, 0.0 }
  0xcb   :  { %v207_v49 = vmin.f32 %v206_v48, 31.0 }
  0xcd   :  { %v208_v50 = vpack.c.bf16 %v207_v49, %v207_v49 }
  0xcf   :  { %281 = vmatmul.bf16.vlgmr.msra.gmra.mxu1 %v208_v50 }
 0x14c   :  { %v282_v59 = vpop.f32.mrf.mxu1 }
 0x14d   :  { %v287_v60 = vmul.f32 %v286_v57, %v282_v59 }
 0x14f   :  { %v292_v61 = vadd.f32 %v563_v58, %v287_v60 }
 0x151   :  { %v293_v63 = vmax.f32 %v292_v61, 0.0 }
 0x153   :  { %v295_v0 = vmul.f32 %v294_v62, %v293_v63 }
 0x154   :  { %v284_v1 = vpop.f32.mrf.mxu1 }
 0x155   :  { %v548_v2 = vcvt.f32.s32 %v295_v0  ;;  %v546_v4 = vand.u32 2147483647, %v295_v0  ;;  %v551_v6 = vand.u32 2147483648, %v295_v0 }
 0x157   :  { %v549_v3 = vcvt.s32.f32 %v548_v2  ;;  %vm547_vm2 = vcmp.lt.f32.partialorder %v546_v4, 8388608.0 }
 0x159   :  { %v550_v5 = vand.u32 2147483647, %v549_v3 }
 0x15b   :  { %v552_v7 = vor.u32 %v551_v6, %v550_v5 }
 0x15d   :  { %v553_v8 = vsel %vm547_vm2, %v552_v7, %v295_v0 }
 0x15e   :  { %v297_v9 = vmax.f32 %v553_v8, 0.0 }
 0x160   :  { %v298_v10 = vmin.f32 %v297_v9, 31.0 }
 0x162   :  { %v299_v11 = vpack.c.bf16 %v298_v10, %v298_v10 }
 0x164   :  { %372 = vmatmul.bf16.vlgmr.msra.gmra.mxu2 %v299_v11 }
 0x1e7   :  { %v373_v14 = vpop.f32.mrf.mxu2 }
 0x1e8   :  { %v378_v15 = vmul.f32 %v377_v12, %v373_v14 }
 0x1ea   :  { %v383_v16 = vadd.f32 %v564_v13, %v378_v15 }
 0x1ec   :  { %384 = vst [vmem:[#allocation12] sm:$0xff] %v383_v16 }
 0x1ed   :  { %395 = dma.vmem_to_hbm [thread:$0]  %s391_s15, 128, %s393_s18, [#allocation4]  }
 0x1ef   :  { %v375_v17 = vpop.f32.mrf.mxu2 }
 0x1f0   :  { %705 = dma.done.wait [#allocation4], 128  }
 0x1f1   :  { %706 = vsyncadd [#allocation4], 4294967168 }
 0x1f2   :  { %400 = vsyncpa [#allocation3], 1 }
 0x1f3   :  { %401 = vsyncpa [#allocation8], 1 }
 0x1f4   :  { %402 = vsyncpa [#allocation11], 1 }
 0x1f5   :  { %403 = vsyncpa [#allocation4], 1 }
 0x1f6   :  { %404 = vsyncpa [#allocation5], 1 }

</bundles_post_ra>
